<compile_context>
chip_gen: v7x
topology: tpu7x:2x2x1
jax: 0.10.0
libtpu: 0.0.40
codegen_flags: <defaults>
</compile_context>

<pallas_src>
import functools
import math

import jax
import jax.numpy as jnp
from jax import lax
from jax.experimental import pallas as pl
from jax.experimental.pallas import tpu as pltpu

CFG_E = [64, 64, 'M', 128, 128, 'M', 256, 256, 256, 256, 'M',
         512, 512, 512, 512, 'M', 512, 512, 512, 512, 'M']
BLK_LEN = 1536
NUM_CLASSES = 172
LEAKY_SLOPE = 0.01          # nn.LeakyReLU() default negative_slope
BN_EPS = 1e-5
ACT_DTYPE = jnp.bfloat16    # bf16 storage, f32 accumulation


@functools.lru_cache(maxsize=None)
def _vmem_capacity():
    try:
        return int(pltpu.get_tpu_info().vmem_capacity_bytes)
    except Exception:
        return 128 * 1024 * 1024


def _vmem_limit_bytes():
    """Generation-aware scoped-VMEM limit (v7x has only 64 MiB physical)."""
    return min(_vmem_capacity() * 3 // 4, 96 * 1024 * 1024)


# ------------- conv3x3 + folded-BN + ReLU (+ vertical half of 2x2 maxpool) ---

def _conv_kernel(top_ref, mid_ref, bot_ref, w_ref, b_ref, o_ref, pad_ref, *,
                 pool):
    """top/bot_ref: (1, 1, W, Cin) halo rows (clamped at the image edge, zeroed
    in-kernel at the boundary blocks); mid_ref: (1, tH, W, Cin);
    w_ref: (3, 3*Cin, tCout) BN-folded weights; b_ref: (1, tCout) f32;
    o_ref: (1, tH//2 if pool else tH, W, tCout);
    pad_ref: VMEM scratch (tH+2, W+2, Cin)."""
    tH = mid_ref.shape[1]
    W = mid_ref.shape[2]
    Cin = mid_ref.shape[3]
    Cout = o_ref.shape[3]
    dt = mid_ref.dtype

    i = pl.program_id(2)                 # row-block axis
    nblk = pl.num_programs(2)

    # Assemble the zero-padded (tH+2, W+2, Cin) window in VMEM (no HBM halo
    # materialization).  Halo rows are zeroed at the top/bottom of the image.
    zc = jnp.zeros((tH + 2, 1, Cin), dt)
    pad_ref[:, 0:1, :] = zc
    pad_ref[:, W + 1:W + 2, :] = zc
    pad_ref[0:1, 1:W + 1, :] = top_ref[0] * (i > 0).astype(dt)
    pad_ref[1:tH + 1, 1:W + 1, :] = mid_ref[0]
    pad_ref[tH + 1:tH + 2, 1:W + 1, :] = bot_ref[0] * (i < nblk - 1).astype(dt)

    rows_p = pad_ref[...]                                  # (tH+2, W+2, Cin)
    # kx taps folded into the contraction (K = 3*Cin); built ONCE per tile.
    shifted = jnp.concatenate(
        [rows_p[:, 0:W], rows_p[:, 1:W + 1], rows_p[:, 2:W + 2]],
        axis=-1)                                           # (tH+2, W, 3*Cin)

    # ky loop: leading-dim slices only; f32 MXU accumulation.
    acc = jnp.dot(shifted[0:tH].reshape(tH * W, 3 * Cin), w_ref[0],
                  preferred_element_type=jnp.float32)
    for ky in (1, 2):
        acc = acc + jnp.dot(shifted[ky:ky + tH].reshape(tH * W, 3 * Cin),
                            w_ref[ky], preferred_element_type=jnp.float32)

    y = jnp.maximum(acc + b_ref[...], 0.0)                 # bias once + ReLU
    if pool:
        # vertical half of the 2x2 maxpool fused into the conv epilogue
        y = y.reshape(tH // 2, 2, W, Cout)
        y = jnp.maximum(y[:, 0], y[:, 1])                  # (tH//2, W, Cout)
    else:
        y = y.reshape(tH, W, Cout)
    o_ref[0] = y.astype(o_ref.dtype)


def _pick_row_tile(H, W, Cin, Cout, pool):
    """Largest divisor of H (even when pooling) whose in-kernel temporaries
    (shifted taps ~2x bf16 + f32 accumulator/epilogue) fit the per-generation
    budget (review item: cap by VMEM bytes, not a fixed M=512)."""
    lane = 128
    k_lanes = -(-3 * Cin // lane) * lane        # lane-padded K width
    c_lanes = -(-Cout // lane) * lane           # lane-padded Cout width
    per_row = W * (2 * 2 * k_lanes + 2 * 4 * c_lanes)
    cap = 8 * 2 ** 20 if _vmem_capacity() <= 64 * 2 ** 20 else 14 * 2 ** 20
    divisors = [d for d in range(1, H + 1)
                if H % d == 0 and (not pool or d % 2 == 0)]
    fitting = [d for d in divisors if d * per_row <= cap]
    return max(fitting) if fitting else min(divisors)


def conv3x3_bn_relu(x, w3, b, *, pool=False, row_tile=None):
    """x: (N, H, W, Cin); w3: (3, 3*Cin, Cout) BN-folded; b: (Cout,) f32.
    Returns (N, H', W', Cout) with H'/W' halved when pool=True."""
    N, H, W, Cin = x.shape
    Cout = w3.shape[-1]
    tH = row_tile or _pick_row_tile(H, W, Cin, Cout, pool)
    assert H % tH == 0 and (not pool or tH % 2 == 0)
    nblk = H // tH
    tHo = tH // 2 if pool else tH

    # Split Cout for the 512-channel layers: keeps >=2 parallel grid steps for
    # the v7x megacore and halves the resident weight block.
    ncb = 2 if Cout >= 512 else 1
    tCout = Cout // ncb

    def top_map(n, c, i):
        return (n, jnp.maximum(i * tH - 1, 0), 0, 0)

    def mid_map(n, c, i):
        return (n, i, 0, 0)

    def bot_map(n, c, i):
        return (n, jnp.minimum((i + 1) * tH, H - 1), 0, 0)

    out = pl.pallas_call(
        functools.partial(_conv_kernel, pool=pool),
        out_shape=jax.ShapeDtypeStruct((N, nblk * tHo, W, Cout), x.dtype),
        grid=(N, ncb, nblk),
        in_specs=[
            pl.BlockSpec((1, 1, W, Cin), top_map),
            pl.BlockSpec((1, tH, W, Cin), mid_map),
            pl.BlockSpec((1, 1, W, Cin), bot_map),
            pl.BlockSpec((3, 3 * Cin, tCout), lambda n, c, i: (0, 0, c)),
            pl.BlockSpec((1, tCout), lambda n, c, i: (0, c)),
        ],
        out_specs=pl.BlockSpec((1, tHo, W, tCout), lambda n, c, i: (n, i, 0, c)),
        scratch_shapes=[pltpu.VMEM((tH + 2, W + 2, Cin), x.dtype)],
        compiler_params=pltpu.CompilerParams(
            dimension_semantics=("parallel", "parallel", "parallel"),
            vmem_limit_bytes=_vmem_limit_bytes()),
    )(x, x, x, w3, b.reshape(1, Cout))

    if pool:
        # horizontal half of the 2x2 maxpool (plain XLA; fuses into one pass)
        out = out.reshape(N, nblk * tHo, W // 2, 2, Cout).max(axis=3)
    return out


# ------------------------------ linear layer --------------------------------

def _linear_kernel(x_ref, w_ref, b_ref, o_ref, acc_ref, *, leaky):
    @pl.when(pl.program_id(1) == 0)
    def _():
        acc_ref[...] = jnp.broadcast_to(
            b_ref[...].astype(jnp.float32), acc_ref.shape)

    acc_ref[...] += jnp.dot(x_ref[...], w_ref[...],
                            preferred_element_type=jnp.float32)

    @pl.when(pl.program_id(1) == pl.num_programs(1) - 1)
    def _():
        y = acc_ref[...]
        if leaky:
            y = jnp.where(y > 0, y, LEAKY_SLOPE * y)       # LeakyReLU
        o_ref[...] = y.astype(o_ref.dtype)


def _largest_divisor_leq(n, cap):
    for d in range(min(n, cap), 0, -1):
        if n % d == 0:
            return d
    return 1


def linear(x, w, b, *, leaky=False, out_dtype=None):
    """x: (B, K); w: (K, N) bf16; b: (N,) f32.  K-tiled, f32 accumulator."""
    B, K = x.shape
    N = w.shape[1]
    out_dtype = out_dtype or x.dtype
    tn = _largest_divisor_leq(N, 512)
    tk = _largest_divisor_leq(K, 8192)      # larger K tiles: fewer grid steps
    # TODO(synk): int8 (v5e/v6e) / fp8 (v7x) weight quantization would halve the
    # fc1/fc2 HBM weight stream but changes numerics; kept bf16 for parity.
    return pl.pallas_call(
        functools.partial(_linear_kernel, leaky=leaky),
        out_shape=jax.ShapeDtypeStruct((B, N), out_dtype),
        grid=(N // tn, K // tk),
        in_specs=[
            pl.BlockSpec((B, tk), lambda j, k: (0, k)),
            pl.BlockSpec((tk, tn), lambda j, k: (k, j)),
            pl.BlockSpec((1, tn), lambda j, k: (0, j)),
        ],
        out_specs=pl.BlockSpec((B, tn), lambda j, k: (0, j)),
        scratch_shapes=[pltpu.VMEM((B, tn), jnp.float32)],
        compiler_params=pltpu.CompilerParams(
            dimension_semantics=("parallel", "arbitrary"),
            vmem_limit_bytes=_vmem_limit_bytes()),
    )(x, w, b.reshape(1, N))


# ------------------------------ parameters ----------------------------------

def init_params(key, image_size):
    """Deterministic init matching the module's initializers.
    conv: kaiming-normal(fan_out, relu), bias 0; BN (eval: mean=0, var=1,
    gamma=1, beta=0) folded into the conv; Linear weights ~ N(0, 0.01)."""
    # TODO(synk): get_updateModel loads a .pt checkpoint; replaced by this init
    # (a real checkpoint would fold gamma/sqrt(var+eps) into w and
    #  beta - mean*scale into the bias).
    params = {"convs": []}
    in_c = 3
    bn_scale = 1.0 / math.sqrt(1.0 + BN_EPS)
    for v in CFG_E:
        if v == 'M':
            continue
        key, kw = jax.random.split(key)
        fan_out = v * 9
        w = jax.random.normal(kw, (3, 3, in_c, v), jnp.float32) * math.sqrt(2.0 / fan_out)
        w = (w * bn_scale).reshape(3, 3 * in_c, v).astype(ACT_DTYPE)
        b = jnp.zeros((v,), jnp.float32)
        params["convs"].append((w, b))
        in_c = v

    flat_dim = 512 * (image_size // 2 ** 5) ** 2

    def linear_init(k, fan_in, fan_out_):
        kw, kb = jax.random.split(k)
        w = (jax.random.normal(kw, (fan_in, fan_out_), jnp.float32) * 0.01
             ).astype(ACT_DTYPE)
        bound = 1.0 / math.sqrt(fan_in)
        b = jax.random.uniform(kb, (fan_out_,), jnp.float32, -bound, bound)
        return w, b

    key, k1, k2, k3, k4 = jax.random.split(key, 5)
    params["vgg_map2vec"] = linear_init(k1, flat_dim, 4096)
    params["vgg_linear"] = linear_init(k2, 4096, 4096)
    params["trans_img2l"] = linear_init(k3, BLK_LEN, BLK_LEN)
    params["classifier_v"] = linear_init(k4, BLK_LEN, NUM_CLASSES)
    return params


# -------------------------------- forward -----------------------------------

def my_model_forward(params, x_nchw):
    x = jnp.transpose(x_nchw, (0, 2, 3, 1)).astype(ACT_DTYPE)   # NCHW -> NHWC
    ci = 0
    i = 0
    while i < len(CFG_E):                                       # VGG19-bn features
        v = CFG_E[i]
        pool = (i + 1 < len(CFG_E) and CFG_E[i + 1] == 'M')
        w, b = params["convs"][ci]
        x = conv3x3_bn_relu(x, w, b, pool=pool)
        ci += 1
        i += 2 if pool else 1
    # flatten in torch NCHW order (== x_latent_maps.view(N, -1))
    n = x.shape[0]
    x_flat = jnp.transpose(x, (0, 3, 1, 2)).reshape(n, -1)
    # get_latent  (Dropout == identity in eval mode)
    # TODO(synk): nn.Dropout is stochastic in train mode; eval identity used.
    h = linear(x_flat, *params["vgg_map2vec"], leaky=True)
    h = linear(h, *params["vgg_linear"], leaky=True)
    # get_predicts_with_align on x_latent[:, 0:blk_len]
    h = h[:, :BLK_LEN]
    h = linear(h, *params["trans_img2l"])
    predicts = linear(h, *params["classifier_v"], out_dtype=jnp.float32)
    return predicts


# ------------------------------ self-check -----------------------------------

def _self_test_conv():
    """Numerically checks the halo / padding logic (multi row-block grid) and
    the fused pooling against lax references, in f32."""
    key = jax.random.PRNGKey(1)
    kx, kw, kb = jax.random.split(key, 3)
    N, H, W, Cin, Cout = 1, 16, 16, 16, 128
    x = jax.random.normal(kx, (N, H, W, Cin), jnp.float32)
    w = jax.random.normal(kw, (3, 3, Cin, Cout), jnp.float32) * 0.1
    b = jax.random.normal(kb, (Cout,), jnp.float32)
    w3 = w.reshape(3, 3 * Cin, Cout)

    ref = lax.conv_general_dilated(
        x, w, window_strides=(1, 1), padding='SAME',
        dimension_numbers=('NHWC', 'HWIO', 'NHWC')) + b
    ref = jnp.maximum(ref, 0.0)

    got = conv3x3_bn_relu(x, w3, b, pool=False, row_tile=4)     # 4 row blocks
    assert jnp.allclose(got, ref, atol=5e-2, rtol=5e-2), "conv mismatch"

    got_p = conv3x3_bn_relu(x, w3, b, pool=True, row_tile=4)
    ref_p = lax.reduce_window(ref, -jnp.inf, lax.max,
                              (1, 2, 2, 1), (1, 2, 2, 1), 'VALID')
    assert jnp.allclose(got_p, ref_p, atol=5e-2, rtol=5e-2), "pool mismatch"


if __name__ == "__main__":
    _self_test_conv()

    IMG = 32   # small stand-in for image_size=256 (still divisible by 2**5)
    key = jax.random.PRNGKey(0)
    k_in, k_par = jax.random.split(key)
    x = jax.random.normal(k_in, (2, 3, IMG, IMG), jnp.float32)
    params = init_params(k_par, IMG)

    fwd = jax.jit(my_model_forward)
    out = jax.block_until_ready(fwd(params, x))

    assert out.shape == (2, NUM_CLASSES) and out.dtype == jnp.float32
    assert bool(jnp.all(jnp.isfinite(out)))
    print("KERNEL_OK")
</pallas_src>

<mosaic_0001>
module attributes {stable_mosaic.version = 11 : i64} {
  func.func @_conv_kernel(%arg0: i32, %arg1: i32, %arg2: i32, %arg3: memref<1x1x16x16xf32, #tpu.memory_space<vmem>>, %arg4: memref<1x4x16x16xf32, #tpu.memory_space<vmem>>, %arg5: memref<1x1x16x16xf32, #tpu.memory_space<vmem>>, %arg6: memref<3x48x128xf32, #tpu.memory_space<vmem>>, %arg7: memref<1x128xf32, #tpu.memory_space<vmem>>, %arg8: memref<1x4x16x128xf32, #tpu.memory_space<vmem>>, %arg9: memref<6x18x16xf32, #tpu.memory_space<vmem>>) attributes {dimension_semantics = [#tpu.dimension_semantics<parallel>, #tpu.dimension_semantics<parallel>, #tpu.dimension_semantics<parallel>], iteration_bounds = array<i64: 1, 1, 4>, scalar_prefetch = 0 : i64, scratch_operands = 1 : i64, tpu.core_type = #tpu.core_type<tc>, window_params = [{transform_indices = @transform_0, window_bounds = array<i64: 1, 1, 16, 16>}, {transform_indices = @transform_1, window_bounds = array<i64: 1, 4, 16, 16>}, {transform_indices = @transform_2, window_bounds = array<i64: 1, 1, 16, 16>}, {transform_indices = @transform_3, window_bounds = array<i64: 3, 48, 128>}, {transform_indices = @transform_4, window_bounds = array<i64: 1, 128>}, {transform_indices = @transform_5, window_bounds = array<i64: 1, 4, 16, 128>}]} {
    %cst = arith.constant 0.000000e+00 : f32
    %0 = vector.broadcast %cst : f32 to vector<6x1x16xf32>
    %c0 = arith.constant 0 : index
    %c0_0 = arith.constant 0 : index
    %c0_1 = arith.constant 0 : index
    %1 = vector.load %arg9[%c0, %c0_0, %c0_1] : memref<6x18x16xf32, #tpu.memory_space<vmem>>, vector<6x1x16xf32>
    tpu.vector_store %arg9[%c0, %c0_0, %c0_1], %0 {strides = array<i32>} : memref<6x18x16xf32, #tpu.memory_space<vmem>>, vector<6x1x16xf32>,
    %c0_2 = arith.constant 0 : index
    %c17 = arith.constant 17 : index
    %c0_3 = arith.constant 0 : index
    %2 = vector.load %arg9[%c0_2, %c17, %c0_3] : memref<6x18x16xf32, #tpu.memory_space<vmem>>, vector<6x1x16xf32>
    tpu.vector_store %arg9[%c0_2, %c17, %c0_3], %0 {strides = array<i32>} : memref<6x18x16xf32, #tpu.memory_space<vmem>>, vector<6x1x16xf32>,
    %c0_4 = arith.constant 0 : index
    %c0_5 = arith.constant 0 : index
    %c0_6 = arith.constant 0 : index
    %c0_7 = arith.constant 0 : index
    %3 = vector.load %arg3[%c0_4, %c0_5, %c0_6, %c0_7] : memref<1x1x16x16xf32, #tpu.memory_space<vmem>>, vector<1x1x16x16xf32>
    %4 = vector.shape_cast %3 : vector<1x1x16x16xf32> to vector<1x16x16xf32>
    %c0_i32 = arith.constant 0 : i32
    %5 = arith.cmpi sgt, %arg2, %c0_i32 : i32
    %6 = arith.extui %5 : i1 to i32
    %7 = arith.sitofp %6 : i32 to f32
    %8 = vector.broadcast %7 : f32 to vector<1x16x16xf32>
    %9 = arith.mulf %4, %8 : vector<1x16x16xf32>
    %c0_8 = arith.constant 0 : index
    %c1 = arith.constant 1 : index
    %c0_9 = arith.constant 0 : index
    %10 = vector.load %arg9[%c0_8, %c1, %c0_9] : memref<6x18x16xf32, #tpu.memory_space<vmem>>, vector<1x16x16xf32>
    tpu.vector_store %arg9[%c0_8, %c1, %c0_9], %9 {strides = array<i32>} : memref<6x18x16xf32, #tpu.memory_space<vmem>>, vector<1x16x16xf32>,
    %c0_10 = arith.constant 0 : index
    %c0_11 = arith.constant 0 : index
    %c0_12 = arith.constant 0 : index
    %c0_13 = arith.constant 0 : index
    %11 = vector.load %arg4[%c0_10, %c0_11, %c0_12, %c0_13] : memref<1x4x16x16xf32, #tpu.memory_space<vmem>>, vector<1x4x16x16xf32>
    %12 = vector.shape_cast %11 : vector<1x4x16x16xf32> to vector<4x16x16xf32>
    %c1_14 = arith.constant 1 : index
    %c1_15 = arith.constant 1 : index
    %c0_16 = arith.constant 0 : index
    %13 = vector.load %arg9[%c1_14, %c1_15, %c0_16] : memref<6x18x16xf32, #tpu.memory_space<vmem>>, vector<4x16x16xf32>
    tpu.vector_store %arg9[%c1_14, %c1_15, %c0_16], %12 {strides = array<i32>} : memref<6x18x16xf32, #tpu.memory_space<vmem>>, vector<4x16x16xf32>,
    %c0_17 = arith.constant 0 : index
    %c0_18 = arith.constant 0 : index
    %c0_19 = arith.constant 0 : index
    %c0_20 = arith.constant 0 : index
    %14 = vector.load %arg5[%c0_17, %c0_18, %c0_19, %c0_20] : memref<1x1x16x16xf32, #tpu.memory_space<vmem>>, vector<1x1x16x16xf32>
    %15 = vector.shape_cast %14 : vector<1x1x16x16xf32> to vector<1x16x16xf32>
    %c3_i32 = arith.constant 3 : i32
    %16 = arith.cmpi slt, %arg2, %c3_i32 : i32
    %17 = arith.extui %16 : i1 to i32
    %18 = arith.sitofp %17 : i32 to f32
    %19 = vector.broadcast %18 : f32 to vector<1x16x16xf32>
    %20 = arith.mulf %15, %19 : vector<1x16x16xf32>
    %c5 = arith.constant 5 : index
    %c1_21 = arith.constant 1 : index
    %c0_22 = arith.constant 0 : index
    %21 = vector.load %arg9[%c5, %c1_21, %c0_22] : memref<6x18x16xf32, #tpu.memory_space<vmem>>, vector<1x16x16xf32>
    tpu.vector_store %arg9[%c5, %c1_21, %c0_22], %20 {strides = array<i32>} : memref<6x18x16xf32, #tpu.memory_space<vmem>>, vector<1x16x16xf32>,
    %c0_23 = arith.constant 0 : index
    %c0_24 = arith.constant 0 : index
    %c0_25 = arith.constant 0 : index
    %22 = vector.load %arg9[%c0_23, %c0_24, %c0_25] : memref<6x18x16xf32, #tpu.memory_space<vmem>>, vector<6x18x16xf32>
    %23 = vector.extract_strided_slice %22 {offsets = [0, 0, 0], sizes = [6, 16, 16], strides = [1, 1, 1]} : vector<6x18x16xf32> to vector<6x16x16xf32>
    %24 = vector.extract_strided_slice %22 {offsets = [0, 1, 0], sizes = [6, 16, 16], strides = [1, 1, 1]} : vector<6x18x16xf32> to vector<6x16x16xf32>
    %25 = vector.extract_strided_slice %22 {offsets = [0, 2, 0], sizes = [6, 16, 16], strides = [1, 1, 1]} : vector<6x18x16xf32> to vector<6x16x16xf32>
    %26 = tpu.concatenate %23, %24, %25 in 2 : vector<6x16x16xf32>, vector<6x16x16xf32>, vector<6x16x16xf32> -> vector<6x16x48xf32>
    %27 = vector.extract_strided_slice %26 {offsets = [0, 0, 0], sizes = [4, 16, 48], strides = [1, 1, 1]} : vector<6x16x48xf32> to vector<4x16x48xf32>
    %28 = vector.shape_cast %27 : vector<4x16x48xf32> to vector<64x48xf32>
    %c0_26 = arith.constant 0 : index
    %c0_27 = arith.constant 0 : index
    %c0_28 = arith.constant 0 : index
    %29 = vector.load %arg6[%c0_26, %c0_27, %c0_28] : memref<3x48x128xf32, #tpu.memory_space<vmem>>, vector<1x48x128xf32>
    %30 = vector.shape_cast %29 : vector<1x48x128xf32> to vector<48x128xf32>
    %cst_29 = arith.constant dense<0.000000e+00> : vector<64x128xf32>
    %31 = tpu.matmul %28, %30, %cst_29 {dimension_numbers = #tpu.dot_dimension_numbers<[1], [0], [0], [1], [0, 0, 1, 1], [], []>} : vector<64x48xf32>, vector<48x128xf32>, vector<64x128xf32> -> vector<64x128xf32>
    %32 = vector.extract_strided_slice %26 {offsets = [1, 0, 0], sizes = [4, 16, 48], strides = [1, 1, 1]} : vector<6x16x48xf32> to vector<4x16x48xf32>
    %33 = vector.shape_cast %32 : vector<4x16x48xf32> to vector<64x48xf32>
    %c1_30 = arith.constant 1 : index
    %c0_31 = arith.constant 0 : index
    %c0_32 = arith.constant 0 : index
    %34 = vector.load %arg6[%c1_30, %c0_31, %c0_32] : memref<3x48x128xf32, #tpu.memory_space<vmem>>, vector<1x48x128xf32>
    %35 = vector.shape_cast %34 : vector<1x48x128xf32> to vector<48x128xf32>
    %cst_33 = arith.constant dense<0.000000e+00> : vector<64x128xf32>
    %36 = tpu.matmul %33, %35, %cst_33 {dimension_numbers = #tpu.dot_dimension_numbers<[1], [0], [0], [1], [0, 0, 1, 1], [], []>} : vector<64x48xf32>, vector<48x128xf32>, vector<64x128xf32> -> vector<64x128xf32>
    %37 = arith.addf %31, %36 : vector<64x128xf32>
    %38 = vector.extract_strided_slice %26 {offsets = [2, 0, 0], sizes = [4, 16, 48], strides = [1, 1, 1]} : vector<6x16x48xf32> to vector<4x16x48xf32>
    %39 = vector.shape_cast %38 : vector<4x16x48xf32> to vector<64x48xf32>
    %c2 = arith.constant 2 : index
    %c0_34 = arith.constant 0 : index
    %c0_35 = arith.constant 0 : index
    %40 = vector.load %arg6[%c2, %c0_34, %c0_35] : memref<3x48x128xf32, #tpu.memory_space<vmem>>, vector<1x48x128xf32>
    %41 = vector.shape_cast %40 : vector<1x48x128xf32> to vector<48x128xf32>
    %cst_36 = arith.constant dense<0.000000e+00> : vector<64x128xf32>
    %42 = tpu.matmul %39, %41, %cst_36 {dimension_numbers = #tpu.dot_dimension_numbers<[1], [0], [0], [1], [0, 0, 1, 1], [], []>} : vector<64x48xf32>, vector<48x128xf32>, vector<64x128xf32> -> vector<64x128xf32>
    %43 = arith.addf %37, %42 : vector<64x128xf32>
    %c0_37 = arith.constant 0 : index
    %c0_38 = arith.constant 0 : index
    %44 = vector.load %arg7[%c0_37, %c0_38] : memref<1x128xf32, #tpu.memory_space<vmem>>, vector<1x128xf32>
    %45 = vector.broadcast %44 : vector<1x128xf32> to vector<64x128xf32>
    %46 = arith.addf %43, %45 : vector<64x128xf32>
    %cst_39 = arith.constant 0.000000e+00 : f32
    %47 = vector.broadcast %cst_39 : f32 to vector<64x128xf32>
    %48 = arith.maximumf %46, %47 : vector<64x128xf32>
    %49 = vector.shape_cast %48 : vector<64x128xf32> to vector<4x16x128xf32>
    %c0_40 = arith.constant 0 : index
    %c0_41 = arith.constant 0 : index
    %c0_42 = arith.constant 0 : index
    %c0_43 = arith.constant 0 : index
    %50 = vector.load %arg8[%c0_40, %c0_41, %c0_42, %c0_43] : memref<1x4x16x128xf32, #tpu.memory_space<vmem>>, vector<1x4x16x128xf32>
    %51 = vector.shape_cast %50 : vector<1x4x16x128xf32> to vector<4x16x128xf32>
    %52 = vector.shape_cast %49 : vector<4x16x128xf32> to vector<1x4x16x128xf32>
    tpu.vector_store %arg8[%c0_40, %c0_41, %c0_42, %c0_43], %52 {strides = array<i32>} : memref<1x4x16x128xf32, #tpu.memory_space<vmem>>, vector<1x4x16x128xf32>,
    return
  }
  func.func @transform_0(%arg0: i32, %arg1: i32, %arg2: i32) -> (i32, i32, i32, i32) {
    %c4_i32 = arith.constant 4 : i32
    %0 = arith.muli %arg2, %c4_i32 : i32
    %c1_i32 = arith.constant 1 : i32
    %1 = arith.subi %0, %c1_i32 : i32
    %c0_i32 = arith.constant 0 : i32
    %2 = arith.maxsi %1, %c0_i32 : i32
    %c0_i32_0 = arith.constant 0 : i32
    %c0_i32_1 = arith.constant 0 : i32
    %c0_i32_2 = arith.constant 0 : i32
    return %arg0, %2, %c0_i32_0, %c0_i32_1 : i32, i32, i32, i32
  }
  func.func @transform_1(%arg0: i32, %arg1: i32, %arg2: i32) -> (i32, i32, i32, i32) {
    %c0_i32 = arith.constant 0 : i32
    %c0_i32_0 = arith.constant 0 : i32
    %c0_i32_1 = arith.constant 0 : i32
    return %arg0, %arg2, %c0_i32, %c0_i32_0 : i32, i32, i32, i32
  }
  func.func @transform_2(%arg0: i32, %arg1: i32, %arg2: i32) -> (i32, i32, i32, i32) {
    %c1_i32 = arith.constant 1 : i32
    %0 = arith.addi %arg2, %c1_i32 : i32
    %c4_i32 = arith.constant 4 : i32
    %1 = arith.muli %0, %c4_i32 : i32
    %c15_i32 = arith.constant 15 : i32
    %2 = arith.minsi %1, %c15_i32 : i32
    %c0_i32 = arith.constant 0 : i32
    %c0_i32_0 = arith.constant 0 : i32
    %c0_i32_1 = arith.constant 0 : i32
    return %arg0, %2, %c0_i32, %c0_i32_0 : i32, i32, i32, i32
  }
  func.func @transform_3(%arg0: i32, %arg1: i32, %arg2: i32) -> (i32, i32, i32) {
    %c0_i32 = arith.constant 0 : i32
    %c0_i32_0 = arith.constant 0 : i32
    %c0_i32_1 = arith.constant 0 : i32
    return %c0_i32, %c0_i32_0, %arg1 : i32, i32, i32
  }
  func.func @transform_4(%arg0: i32, %arg1: i32, %arg2: i32) -> (i32, i32) {
    %c0_i32 = arith.constant 0 : i32
    %c0_i32_0 = arith.constant 0 : i32
    return %c0_i32, %arg1 : i32, i32
  }
  func.func @transform_5(%arg0: i32, %arg1: i32, %arg2: i32) -> (i32, i32, i32, i32) {
    %c0_i32 = arith.constant 0 : i32
    %c0_i32_0 = arith.constant 0 : i32
    return %arg0, %arg2, %c0_i32, %arg1 : i32, i32, i32, i32
  }
}

</mosaic_0001>

<bundles_post_ra>
// kernel: tpu_custom_call.1
= control target key start
LH: loop header
LB: loop body
LE: loop exit
PB: predicated region body
PF: predicated region fallthrough
CT: control target
= control target key end

     0   :  { %s2648_s0 = inlined_call_operand.hbm [shape: f32[1,16,16,16], index: 0, kind: input, shape index: {}]   ;;  %s2649_s1 = inlined_call_operand.hbm [shape: f32[1,16,16,16], index: 1, kind: input, shape index: {}]   ;;  %s2650_s2 = inlined_call_operand.hbm [shape: f32[1,16,16,16], index: 2, kind: input, shape index: {}]   ;;  %s2651_s3 = inlined_call_operand.hbm [shape: f32[3,48,128], index: 3, kind: input, shape index: {}]   ;;  %s2652_s4 = inlined_call_operand.hbm [shape: f32[1,128], index: 4, kind: input, shape index: {}]   ;;  %s2653_s5 = inlined_call_operand.hbm [shape: f32[1,16,16,128], index: 5, kind: output, shape index: {}]  }
   0x1   :  { %2674 = sst [smem:[#allocation25_spill]] %s2649_s1 }
   0x2   :  { %2675 = sst [smem:[#allocation26_spill]] %s2651_s3 }
   0x3   :  { %2676 = sst [smem:[#allocation27_spill]] %s2652_s4 }
   0x4   :  { %2677 = sst [smem:[#allocation28_spill]] %s2653_s5 }
   0x5   :  { %10 = vsyncpa [#allocation4], 0 }
   0x6   :  { %12 = vsyncpa [#allocation4 + $0x1], 0 }
   0x7   :  { %13 = vsyncpa [#allocation7], 0 }
   0x8   :  { %15 = vsyncpa [#allocation7 + $0x1], 0 }
   0x9   :  { %16 = vsyncpa [#allocation10], 0 }
   0xa   :  { %17 = vsyncpa [#allocation5], 0 }
   0xb   :  { %19 = vsyncpa [#allocation5 + $0x1], 0  ;;  %s1998_s18 = smov 0   ;;  %s2000_s19 = smov 0  }
   0xc   :  { %s2002_s20 = smov 0   ;;  %s2004_s21 = smov 0  }
   0xd   :  { %s2006_s22 = smov 0   ;;  %s2008_s23 = smov 0  }
   0xe   :  { %s2010_s24 = smov 0   ;;  %s2012_s25 = smov 0  }
   0xf   :  { %s2014_s26 = smov 0   ;;  %s2016_s27 = smov 0  }
  0x10   :  { %s2018_s28 = smov 0   ;;  %s2020_s29 = smov 0  }
  0x11 LB: > { %2678 = sst [smem:[#allocation18_spill]] %s1921_s21  ;;  %s2059_s30 = sadd.s32 4294967295, %s1953_s29   ;;  %s1953_s29 = sphi %s2020_s29, %s25_s29   ;;  %s1949_s28 = sphi %s2018_s28, %s2737_s28   ;;  %s1945_s27 = sphi %s2016_s27, %s2736_s27   ;;  %s1941_s26 = sphi %s2014_s26, %s2735_s26   ;;  %s1937_s25 = sphi %s2012_s25, %s2734_s25   ;;  %s1933_s24 = sphi %s2010_s24, %s2733_s24   ;;  %s1929_s23 = sphi %s2008_s23, %s2726_s23   ;;  %s1925_s22 = sphi %s2006_s22, %s2732_s22   ;;  %s1921_s21 = sphi %s2004_s21, %s2731_s21   ;;  %s1917_s20 = sphi %s2002_s20, %s2730_s20   ;;  %s1913_s19 = sphi %s2000_s19, %s2729_s19   ;;  %s1909_s18 = sphi %s1998_s18, %s2728_s18  }
  0x12   : > { %2679 = sst [smem:[#allocation19_spill]] %s1929_s23  ;;  %p1278_p0 = scmp.ge.s32.totalorder %s1953_s29, 1 }
  0x13   : > { %2680 = sst [smem:[#allocation20_spill]] %s1945_s27  ;;  %p2654_p1 = scmp.eq.s32.totalorder %s2059_s30, 0 }
  0x14   : > { %p231_p3 = scmp.lt.s32.totalorder %s1953_s29, 5  ;;  %s1955_s7 = smov [#allocation9]  }
  0x15   : > { %s245_s8 = sshll.u32 %s1955_s7, 4  ;;  %s2683_s3 = sld [smem:[#allocation26_spill]]  ;;  %s246_s8 = int_to_ptr.vmem [resolvable:$true] %s245_s8 }
  0x16   : > { %p2065_p4 = pnand %p1278_p0, %p231_p3 }
  0x18   : > { %s2681_s6 = scalar_select %p2065_p4, 1, 0 }
  0x19   : > { %p1533_p5 = pneg %p2065_p4 }
  0x1b   : > { %p2073_p6 = pnand %p1533_p5, %p2654_p1  ;;  %s1665_s12 = scalar_lea.hbm %s2683_s3, 2304 }
  0x1c   : > { %p1666_p7 = scmp.ne.s32.totalorder %s2683_s3, %s1665_s12  ;;  %p1672_p11 = scmp.lt.u32.totalorder %s1665_s12, %s2683_s3 }
  0x1d   : > { %p2669_p8 = pneg %p2073_p6 }
  0x1f   : > { %p1668_p9 = pnand %p2669_p8, %p1666_p7 }
  0x21   : > { %p1669_p10 = pneg %p1668_p9 }
  0x23   : > { %p1674_p12 = pnand %p1672_p11, %p1669_p10 }
  0x25   : > { %1677 = shalt.err (!%p1674_p12)
}
  0x26   : > { %s1678_s17 = scalar_lea.vmem %s246_s8, 2304  ;;  %p1686_p5 = scmp.lt.s32.totalorder %s246_s8, %s246_s8 }
  0x27   : > { %p1679_p13 = scmp.ne.s32.totalorder %s246_s8, %s1678_s17  ;;  %p1687_p1 = scmp.lt.s32.totalorder %s1678_s17, %s1678_s17 }
  0x29   : > { %p1681_p0 = pnand %p1679_p13, %p2669_p8  ;;  %p1688_p2 = por %p1687_p1, %p1686_p5 }
  0x2b   : > { %p1682_p3 = pneg %p1681_p0 }
  0x2d   : > { %p1689_p4 = pnand %p1688_p2, %p1682_p3 }
  0x2f   : > { %1692 = shalt.err (!%p1689_p4)
}
  0x30   : > { %s2656_s7 = smov 128   ;;  %s2658_s10 = smov 8  }
  0x31   : > { %1536 = dma.hbm_to_vmem [thread:$0]  (!%p2073_p6), %s2683_s3, 2304, %s246_s8, [#allocation10], %s2656_s7, %s2656_s7, %s2658_s10  }
  0x32   : > { %s1271_s13 = sadd.s32 4294967294, %s1953_s29   ;;  %s37_s14 = sadd.s32 1, %s1949_s28 }
  0x33   : > { %p38_p1 = scmp.ge.s32.totalorder %s37_s14, 4  ;;  %p2668_p2 = scmp.eq.s32.totalorder %s1953_s29, 0 }
  0x34   : > { %s89_s15 = sadd.s32 1, %s1929_s23  ;;  %p96_p4 = scmp.ne.s32.totalorder %s1929_s23, %s1925_s22 }
  0x35   : > { %s2739_s14 = smov (%p38_p1, %s37_s14), 0  ;;  %p102_p9 = scmp.ne.s32.totalorder %s1925_s22, %s1921_s21 }
  0x36   : > { %2684 = sst [smem:[#allocation21_spill]] %s2739_s14  ;;  %p2112_p7 = por %p96_p4, %p2668_p2 }
  0x37   : > { %s85_s8 = ssub.s32 %s1949_s28, %s2739_s14  ;;  %p2686_p10 = scmp.eq.s32.totalorder %s2059_s30, 3 }
  0x38   : > { %p87_p12 = scmp.eq.s32.totalorder %s85_s8, 0  ;;  %p2689_p13 = scmp.eq.s32.totalorder %s2059_s30, 0 }
  0x39   : > { %p2122_p11 = por %p2686_p10, %p96_p4  ;;  %p224_p3 = scmp.eq.s32.totalorder %s1271_s13, 3 }
  0x3a   : > { %p2128_p0 = por %p102_p9, %p2689_p13  ;;  %p2667_p5 = scmp.lt.s32.totalorder %s1953_s29, 4 }
  0x3b   : > { %s2687_s17 = scalar_select %p2122_p11, 1, 0 }
  0x3c   : > { %s2690_s11 = scalar_select %p2128_p0, 1, 0 }
  0x3d   : > { %2688 = sst [smem:[#allocation22_spill]] %s2687_s17  ;;  %p2136_p1 = por %p224_p3, %p102_p9 }
  0x3e   : > { %s2134_s12 = scalar_select %p87_p12, %s1929_s23, %s89_s15  }
  0x3f   : > { %s2692_s7 = scalar_select %p2136_p1, 1, 0 }
  0x40   : > { %2691 = sst [smem:[#allocation23_spill]] %s2134_s12  ;;  %s299_s10 = sand.u32 1, %s1953_s29  }
  0x41   : > { %2693 = sst [smem:[#allocation24_spill]] %s2692_s7  ;;  %s301_s3 = sand.u32 1, %s1929_s23  }
  0x42   : > { %s1287_s21 = sshll.u32 %s301_s3, 6  ;;  %s1339_s5 = sshll.u32 %s1949_s28, 10 }
  0x43   : > { %s2694_s1 = sld [smem:[#allocation25_spill]]  ;;  %s303_s13 = scalar_lea.vmem [#allocation6], %s1287_s21 }
  0x44   : > { %s313_s15 = sshll.u32 %s303_s13, 4  ;;  %p2152_p4 = pnand %p2667_p5, %p2112_p7  ;;  %s2156_s15 = int_to_ptr.vmem [resolvable:$true] %s313_s15 }
  0x45   : > { %s1958_s3 = smov [#allocation11]  }
  0x46   : > { %s2158_s27 = sshll.u32 %s1958_s3, 4  ;;  %p1695_p10 = pneg %p2152_p4  ;;  %s262_s27 = int_to_ptr.vmem [resolvable:$true] %s2158_s27 }
  0x49   : > { %s2146_s8 = scalar_lea.hbm %s2694_s1, %s1339_s5  ;;  %s2160_s5 = scalar_lea.sflag [#allocation7], %s299_s10 }
  0x4a   : > { %s1693_s17 = scalar_lea.hbm %s2146_s8, 1024  ;;  %s1698_s13 = scalar_lea.hbm %s2694_s1, 4096 }
  0x4b   : > { %p1694_p9 = scmp.ne.s32.totalorder %s2146_s8, %s1693_s17  ;;  %p1699_p13 = scmp.lt.u32.totalorder %s2146_s8, %s2694_s1 }
  0x4c   : > { %p1700_p3 = scmp.lt.u32.totalorder %s1698_s13, %s1693_s17  ;;  %p1702_p2 = scmp.lt.u32.totalorder %s1693_s17, %s2146_s8 }
  0x4d   : > { %p1696_p12 = pnand %p1695_p10, %p1694_p9 }
  0x4e   : > { %p1701_p5 = por %p1700_p3, %p1699_p13 }
  0x4f   : > { %p1697_p7 = pneg %p1696_p12 }
  0x50   : > { %p1703_p8 = por %p1702_p2, %p1701_p5 }
  0x52   : > { %p1704_p1 = pnand %p1703_p8, %p1697_p7 }
  0x54   : > { %1707 = shalt.err (!%p1704_p1)
}
  0x55   : > { %s1708_s10 = scalar_lea.vmem %s2156_s15, 1024  ;;  %s1959_s3 = smov [#allocation6]  }
  0x56   : > { %p1709_p9 = scmp.ne.s32.totalorder %s2156_s15, %s1708_s10  ;;  %s1713_s21 = sshll.u32 %s1959_s3, 4  ;;  %s1714_s21 = int_to_ptr.vmem [resolvable:$false] %s1713_s21 }
  0x57   : > { %s1715_s23 = scalar_lea.vmem %s1714_s21, 2048  ;;  %p1716_p0 = scmp.lt.s32.totalorder %s2156_s15, %s1714_s21 }
  0x58   : > { %p1711_p12 = pnand %p1709_p9, %p1695_p10  ;;  %p1717_p13 = scmp.lt.s32.totalorder %s1715_s23, %s1708_s10 }
  0x5a   : > { %p1712_p11 = pneg %p1711_p12  ;;  %p1718_p3 = por %p1717_p13, %p1716_p0 }
  0x5c   : > { %p1719_p2 = pnand %p1718_p3, %p1712_p11 }
  0x5e   : > { %1722 = shalt.err (!%p1719_p2)
}
  0x5f   : > { %s2696_s7 = smov 8   ;;  %s2697_s17 = smov 128  }
  0x60   : > { %1546 = dma.hbm_to_vmem [thread:$0]  (!%p2152_p4), %s2146_s8, 1024, %s2156_s15, %s2160_s5, %s2697_s17, %s2697_s17, %s2696_s7  }
  0x61   : > { %s2698_s4 = sld [smem:[#allocation27_spill]]  ;;  %p2699_p11 = pneg %p2073_p6 }
  0x67   : > { %s1723_s3 = scalar_lea.hbm %s2698_s4, 16 }
  0x68   : > { %p1724_p8 = scmp.ne.s32.totalorder %s2698_s4, %s1723_s3  ;;  %p1730_p1 = scmp.lt.u32.totalorder %s1723_s3, %s2698_s4 }
  0x6a   : > { %p1726_p0 = pnand %p1724_p8, %p2699_p11 }
  0x6c   : > { %p1727_p5 = pneg %p1726_p0 }
  0x6e   : > { %p1732_p10 = pnand %p1730_p1, %p1727_p5 }
  0x70   : > { %1735 = shalt.err (!%p1732_p10)
}
  0x71   : > { %s1736_s8 = scalar_lea.vmem %s262_s27, 16  ;;  %p2700_p7 = pmov %p2699_p11 }
  0x72   : > { %p1737_p4 = scmp.ne.s32.totalorder %s262_s27, %s1736_s8  ;;  %s1743_s15 = scalar_lea.vmem %s262_s27, 32 }
  0x73   : > { %p1744_p13 = scmp.lt.s32.totalorder %s262_s27, %s262_s27  ;;  %p1745_p3 = scmp.lt.s32.totalorder %s1743_s15, %s1736_s8 }
  0x74   : > { %p1739_p9 = pnand %p1737_p4, %p2700_p7 }
  0x75   : > { %p1746_p2 = por %p1745_p3, %p1744_p13 }
  0x76   : > { %p1740_p12 = pneg %p1739_p9 }
  0x78   : > { %p1747_p8 = pnand %p1746_p2, %p1740_p12 }
  0x7a   : > { %1750 = shalt.err (!%p1747_p8)
}
  0x7b   : > { %1539 = dma.hbm_to_vmem [thread:$0]  (!%p2073_p6), %s2698_s4, 16, %s262_s27, [#allocation10]  }
  0x7c   : > { %s1272_s3 = sshll.u32 %s1949_s28, 2  ;;  %s1274_s21 = sshll.u32 %s2739_s14, 2 }
  0x7d   : > { %s1273_s10 = sadd.s32 4294967295, %s1272_s3  ;;  %s1275_s9 = sadd.s32 4294967295, %s1274_s21 }
  0x7e   : > { %p50_p11 = scmp.gt.s32.totalorder %s1273_s10, 0  ;;  %p54_p0 = scmp.gt.s32.totalorder %s1275_s9, 0 }
  0x7f   : > { %s61_s12 = sadd.s32 1, %s1941_s26  ;;  %p68_p5 = scmp.ne.s32.totalorder %s1941_s26, %s1937_s25 }
  0x80   : > { %s2741_s10 = smov (!%p50_p11, %s1273_s10), 0  ;;  %s2743_s9 = smov (!%p54_p0, %s1275_s9), 0 }
  0x81   : > { %p74_p1 = scmp.ne.s32.totalorder %s1937_s25, %s1933_s24  ;;  %s57_s23 = ssub.s32 %s2741_s10, %s2743_s9 }
  0x82   : > { %s2219_s8 = sadd.s32 4, %s1272_s3  ;;  %p59_p6 = scmp.eq.s32.totalorder %s57_s23, 0 }
  0x83   : > { %p2701_p10 = scmp.eq.s32.totalorder %s1953_s29, 0  ;;  %p2702_p7 = scmp.eq.s32.totalorder %s2059_s30, 0 }
  0x84   : > { %s2231_s15 = scalar_select %p59_p6, %s1941_s26, %s61_s12  }
  0x85   : > { %p70_p4 = por %p2701_p10, %p68_p5  ;;  %p2225_p9 = por %p2702_p7, %p74_p1 }
  0x86   : > { %s2233_s16 = sadd.s32 4, %s1274_s21  ;;  %s272_s24 = sand.u32 1, %s1941_s26  }
  0x87   : > { %s1282_s13 = sshll.u32 %s272_s24, 4  ;;  %s1337_s3 = sshll.u32 %s2741_s10, 8 }
  0x88   : > { %s2240_s23 = scalar_lea.hbm %s2648_s0, %s1337_s3  ;;  %s276_s4 = scalar_lea.vmem [#allocation3], %s1282_s13 }
  0x89   : > { %s289_s14 = sshll.u32 %s276_s4, 4  ;;  %p2704_p3 = scmp.lt.s32.totalorder %s1953_s29, 4  ;;  %s2248_s14 = int_to_ptr.vmem [resolvable:$true] %s289_s14 }
  0x8a   : > { %s2250_s10 = scalar_lea.sflag [#allocation4], %s272_s24  ;;  %s1751_s1 = scalar_lea.hbm %s2240_s23, 256 }
  0x8b   : > { %p2244_p2 = pnand %p2704_p3, %p70_p4  ;;  %p1752_p8 = scmp.ne.s32.totalorder %s2240_s23, %s1751_s1 }
  0x8c   : > { %s1756_s13 = scalar_lea.hbm %s2648_s0, 4096  ;;  %p1757_p1 = scmp.lt.u32.totalorder %s2240_s23, %s2648_s0 }
  0x8d   : > { %p1753_p11 = pneg %p2244_p2  ;;  %p1758_p6 = scmp.lt.u32.totalorder %s1756_s13, %s1751_s1 }
  0x8e   : > { %p1760_p4 = scmp.lt.u32.totalorder %s1751_s1, %s2240_s23 }
  0x8f   : > { %p1754_p0 = pnand %p1753_p11, %p1752_p8  ;;  %p1759_p10 = por %p1758_p6, %p1757_p1 }
  0x91   : > { %p1755_p5 = pneg %p1754_p0  ;;  %p1761_p7 = por %p1760_p4, %p1759_p10 }
  0x93   : > { %p1762_p3 = pnand %p1761_p7, %p1755_p5 }
  0x95   : > { %1765 = shalt.err (!%p1762_p3)
}
  0x96   : > { %s1766_s24 = scalar_lea.vmem %s2248_s14, 256  ;;  %s1960_s4 = smov [#allocation3]  }
  0x97   : > { %p1767_p8 = scmp.ne.s32.totalorder %s2248_s14, %s1766_s24  ;;  %s1771_s12 = sshll.u32 %s1960_s4, 4  ;;  %s1772_s12 = int_to_ptr.vmem [resolvable:$false] %s1771_s12 }
  0x98   : > { %s1773_s3 = scalar_lea.vmem %s1772_s12, 512  ;;  %p1774_p12 = scmp.lt.s32.totalorder %s2248_s14, %s1772_s12 }
  0x99   : > { %p1769_p0 = pnand %p1767_p8, %p1753_p11  ;;  %p1775_p1 = scmp.lt.s32.totalorder %s1773_s3, %s1766_s24 }
  0x9b   : > { %p1770_p13 = pneg %p1769_p0  ;;  %p1776_p6 = por %p1775_p1, %p1774_p12 }
  0x9d   : > { %p1777_p10 = pnand %p1776_p6, %p1770_p13 }
  0x9f   : > { %1780 = shalt.err (!%p1777_p10)
}
  0xa0   : > { %1543 = dma.hbm_to_vmem [thread:$0]  (!%p2244_p2), %s2240_s23, 256, %s2248_s14, %s2250_s10, %s2697_s17, %s2697_s17, %s2696_s7  }
  0xa1   : > { %p2706_p12 = scmp.lt.s32.totalorder %s2219_s8, 15  ;;  %p2707_p13 = scmp.lt.s32.totalorder %s2233_s16, 15 }
  0xa2   : > { %s125_s21 = sadd.s32 1, %s1917_s20  ;;  %p132_p11 = scmp.ne.s32.totalorder %s1917_s20, %s1913_s19 }
  0xa3   : > { %s2745_s8 = smov (!%p2706_p12, %s2219_s8), 15  ;;  %s2747_s16 = smov (!%p2707_p13, %s2233_s16), 15 }
  0xa4   : > { %s121_s1 = ssub.s32 %s2745_s8, %s2747_s16  ;;  %p138_p5 = scmp.ne.s32.totalorder %s1913_s19, %s1909_s18 }
  0xa5   : > { %p123_p4 = scmp.eq.s32.totalorder %s121_s1, 0  ;;  %p2708_p7 = scmp.eq.s32.totalorder %s1953_s29, 0 }
  0xa6   : > { %p2709_p8 = scmp.eq.s32.totalorder %s2059_s30, 0  ;;  %s325_s9 = sand.u32 1, %s1917_s20  }
  0xa7   : > { %p134_p3 = por %p132_p11, %p2708_p7  ;;  %s1291_s14 = sshll.u32 %s325_s9, 4 }
  0xa8   : > { %p2296_p0 = por %p138_p5, %p2709_p8  ;;  %s1342_s23 = sshll.u32 %s2745_s8, 8 }
  0xa9   : > { %s2302_s24 = scalar_select %p123_p4, %s1917_s20, %s125_s21  }
  0xaa   : > { %s2710_s13 = scalar_select %p2296_p0, 1, 0 }
  0xab   : > { %s2307_s12 = scalar_lea.hbm %s2650_s2, %s1342_s23  ;;  %s327_s18 = scalar_lea.vmem [#allocation8], %s1291_s14 }
  0xac   : > { %s340_s16 = sshll.u32 %s327_s18, 4  ;;  %p2711_p2 = scmp.lt.s32.totalorder %s1953_s29, 4  ;;  %s2315_s16 = int_to_ptr.vmem [resolvable:$true] %s340_s16 }
  0xad   : > { %s1781_s8 = scalar_lea.hbm %s2307_s12, 256  ;;  %s1786_s9 = scalar_lea.hbm %s2650_s2, 4096 }
  0xae   : > { %p2311_p1 = pnand %p2711_p2, %p134_p3  ;;  %p1782_p6 = scmp.ne.s32.totalorder %s2307_s12, %s1781_s8 }
  0xaf   : > { %p1787_p11 = scmp.lt.u32.totalorder %s2307_s12, %s2650_s2  ;;  %p1788_p5 = scmp.lt.u32.totalorder %s1786_s9, %s1781_s8 }
  0xb0   : > { %p1783_p10 = pneg %p2311_p1  ;;  %p1790_p7 = scmp.lt.u32.totalorder %s1781_s8, %s2307_s12 }
  0xb1   : > { %p1789_p4 = por %p1788_p5, %p1787_p11 }
  0xb2   : > { %p1784_p12 = pnand %p1783_p10, %p1782_p6 }
  0xb3   : > { %p1791_p3 = por %p1790_p7, %p1789_p4 }
  0xb4   : > { %p1785_p13 = pneg %p1784_p12 }
  0xb6   : > { %p1792_p8 = pnand %p1791_p3, %p1785_p13 }
  0xb8   : > { %1795 = shalt.err (!%p1792_p8)
}
  0xb9   : > { %s1796_s10 = scalar_lea.vmem %s2315_s16, 256  ;;  %s1961_s4 = smov [#allocation8]  }
  0xba   : > { %p1797_p2 = scmp.ne.s32.totalorder %s2315_s16, %s1796_s10  ;;  %s1801_s18 = sshll.u32 %s1961_s4, 4  ;;  %s1802_s18 = int_to_ptr.vmem [resolvable:$false] %s1801_s18 }
  0xbb   : > { %s1803_s21 = scalar_lea.vmem %s1802_s18, 512  ;;  %p1804_p0 = scmp.lt.s32.totalorder %s2315_s16, %s1802_s18 }
  0xbc   : > { %p1799_p6 = pnand %p1797_p2, %p1783_p10  ;;  %p1805_p11 = scmp.lt.s32.totalorder %s1803_s21, %s1796_s10 }
  0xbe   : > { %p1800_p12 = pneg %p1799_p6  ;;  %p1806_p5 = por %p1805_p11, %p1804_p0 }
  0xc0   : > { %p1807_p4 = pnand %p1806_p5, %p1800_p12 }
  0xc2   : > { %1810 = shalt.err (!%p1807_p4)
}
  0xc3   : > { %1549 = dma.hbm_to_vmem [thread:$0]  (!%p2311_p1), %s2307_s12, 256, %s2315_s16, %s2160_s5, %s2697_s17, %s2697_s17, %s2696_s7  }
  0xc4   : > { %p2713_p10 = scmp.ne.s32.totalorder %s2681_s6, 0 }
  0xc5   : > { %s354_s8 = sand.u32 (!%p2713_p10), 1, %s1937_s25  }
  0xc6   : > { %352 = sbr.rel (%p2713_p10) target bundleno = 633 (0x279), region = 40  ;;  %s2349_s1 = sshll.u32 (!%p2713_p10), %s354_s8, 4 }
  0xc7   : > { %s355_s9 = scalar_lea.sflag (!%p2713_p10), [#allocation4], %s354_s8  ;;  %s358_s14 = scalar_lea.vmem (!%p2713_p10), [#allocation3], %s2349_s1 }
  0xcd   : > { %1888 = dma.done.wait (%p2225_p9), %s355_s9, 256  }
  0xce   : > { %1890 = vsyncadd (%p2225_p9), %s355_s9, 4294967040  ;;  %s363_s5 = sand.u32 1, %s2059_s30   ;;  %s365_s6 = sand.u32 1, %s1925_s22  }
  0xcf   : > { %s2360_s7 = sshll.u32 %s365_s6, 6  ;;  %s364_s17 = scalar_lea.sflag [#allocation7], %s363_s5 }
  0xd0   : > { %s2363_s12 = scalar_lea.vmem [#allocation6], %s2360_s7  ;;  %p2714_p0 = scmp.ne.s32.totalorder %s2690_s11, 0 }
  0xd2   : > { %1892 = dma.done.wait (%p2714_p0), %s364_s17, 1024  }
  0xd3   : > { %1894 = vsyncadd (%p2714_p0), %s364_s17, 4294966272  ;;  %s374_s27 = sand.u32 1, %s1913_s19   ;;  %p2715_p9 = scmp.ne.s32.totalorder %s2710_s13, 0 }
  0xd4   : > { %s2370_s16 = sshll.u32 %s374_s27, 4 }
  0xd5   : > { %s376_s3 = scalar_lea.vmem [#allocation8], %s2370_s16 }
  0xd6   : > { %1896 = dma.done.wait (%p2715_p9), %s364_s17, 256  }
  0xd7   : > { %1898 = vsyncadd (%p2715_p9), %s364_s17, 4294967040  ;;  %p2716_p1 = scmp.eq.s32.totalorder %s2059_s30, 0 }
  0xd9   : > { %1900 = dma.done.wait (%p2716_p1), [#allocation10], 2320   ;;  %p2717_p13 = pmov %p2716_p1 }
  0xda   : > { %s2718_s11 = sld [smem:[#allocation20_spill]]  ;;  %vm431_vm0 = vcmask 122880   ;;  %v1962_v0 = vmov 0.0   ;;  %vm452_vm1 = vcmask 130048   ;;  %v455_v1 = vld [vmem:[%s2363_s12] sm:$0xff]  ;;  %v456_v2 = vld [vmem:[%s2363_s12 + $0x8] sm:$0xff] }
  0xdb   : > { %1902 = vsyncadd (%p2717_p13), [#allocation10], 4294964976  ;;  %439 = vst.msk [vmem:[#allocation2 + $0x29] sm:$0x1] %vm431_vm0, %v1962_v0  ;;  %v457_v3 = vld [vmem:[%s2363_s12 + $0x10] sm:$0xff]  ;;  %v458_v4 = vld [vmem:[%s2363_s12 + $0x18] sm:$0xff] }
  0xdc   : > { %432 = vst.msk [vmem:[#allocation2] sm:$0x1] %vm431_vm0, %v1962_v0  ;;  %433 = vst.msk [vmem:[#allocation2 + $0x18] sm:$0x1] %vm431_vm0, %v1962_v0  ;;  %v444_v5 = vld [vmem:[%s358_s14] sm:$0xff]  ;;  %v445_v6 = vld [vmem:[%s358_s14 + $0x8] sm:$0xff] }
  0xdd   : > { %434 = vst.msk [vmem:[#allocation2 + $0x30] sm:$0x1] %vm431_vm0, %v1962_v0  ;;  %435 = vst.msk [vmem:[#allocation2 + $0x48] sm:$0x1] %vm431_vm0, %v1962_v0  ;;  %v459_v10 = vld [vmem:[%s2363_s12 + $0x20] sm:$0xff]  ;;  %v460_v11 = vld [vmem:[%s2363_s12 + $0x28] sm:$0xff] }
  0xde   : > { %436 = vst.msk [vmem:[#allocation2 + $0x60] sm:$0x1] %vm431_vm0, %v1962_v0  ;;  %437 = vst.msk [vmem:[#allocation2 + $0x78] sm:$0x1] %vm431_vm0, %v1962_v0  ;;  %v461_v12 = vld [vmem:[%s2363_s12 + $0x30] sm:$0xff]  ;;  %v462_v14 = vld [vmem:[%s2363_s12 + $0x38] sm:$0xff] }
  0xdf   : > { %438 = vst.msk [vmem:[#allocation2 + $0x11] sm:$0x1] %vm431_vm0, %v1962_v0  ;;  %440 = vst.msk [vmem:[#allocation2 + $0x41] sm:$0x1] %vm431_vm0, %v1962_v0  ;;  %v472_v15 = vld [vmem:[%s376_s3] sm:$0xff]  ;;  %v473_v16 = vld [vmem:[%s376_s3 + $0x8] sm:$0xff] }
  0xe0   : > { %441 = vst.msk [vmem:[#allocation2 + $0x59] sm:$0x1] %vm431_vm0, %v1962_v0  ;;  %442 = vst.msk [vmem:[#allocation2 + $0x71] sm:$0x1] %vm431_vm0, %v1962_v0  ;;  %p446_p7 = scmp.gt.s32.totalorder %s2718_s11, 0  ;;  %p474_p3 = scmp.lt.s32.totalorder %s2718_s11, 3 }
  0xe1   : > { %443 = vst.msk [vmem:[#allocation2 + $0x89] sm:$0x1] %vm431_vm0, %v1962_v0  ;;  %v685_v19 = vld [vmem:[#allocation9 + $0x30] sm:$0xff]  ;;  %v686_v20 = vld [vmem:[#allocation9 + $0x38] sm:$0xff]  ;;  %v687_v21 = vld [vmem:[#allocation9 + $0x40] sm:$0xff]  ;;  %vm519_vm2 = vcmask 1046528  }
  0xe2   : > { %s447_s30 = scalar_select %p446_p7, 1, 0  ;;  %464 = vst.msk [vmem:[#allocation2 + $0x19] sm:$0xff] %vm452_vm1, %v455_v1  ;;  %465 = vst.msk [vmem:[#allocation2 + $0x21] sm:$0xff] %vm452_vm1, %v456_v2  ;;  %v1459_v22 = vpack.c.bf16 %v686_v20, %v685_v19  ;;  %v688_v23 = vld [vmem:[#allocation9 + $0x48] sm:$0xff]  ;;  %v678_v25 = vld [vmem:[#allocation9] sm:$0xff] }
  0xe3   : > { %s475_s13 = scalar_select %p474_p3, 1, 0  ;;  %466 = vst.msk [vmem:[#allocation2 + $0x31] sm:$0xff] %vm452_vm1, %v457_v3  ;;  %467 = vst.msk [vmem:[#allocation2 + $0x39] sm:$0xff] %vm452_vm1, %v458_v4  ;;  %v1463_v24 = vpack.c.bf16 %v688_v23, %v687_v21  ;;  %v679_v26 = vld [vmem:[#allocation9 + $0x8] sm:$0xff]  ;;  %v689_v27 = vld [vmem:[#allocation9 + $0x50] sm:$0xff] }
  0xe4   : > { %s448_s23 = scvt.s32.f32 %s447_s30  ;;  %468 = vst.msk [vmem:[#allocation2 + $0x49] sm:$0xff] %vm452_vm1, %v459_v10  ;;  %469 = vst.msk [vmem:[#allocation2 + $0x51] sm:$0xff] %vm452_vm1, %v460_v11  ;;  %1460 = vmatprep.subr.bf16.mxu1 %v1459_v22  ;;  %v690_v28 = vld [vmem:[#allocation9 + $0x58] sm:$0xff]  ;;  %v1471_v29 = vpack.c.bf16 %v679_v26, %v678_v25  ;;  %vm586_vm3 = vcmask 1045504   ;;  %s1963_s4 = smov 16   ;;  %v680_v58 = vld [vmem:[#allocation9 + $0x10] sm:$0xff] }
  0xe5   : > { %s476_s10 = scvt.s32.f32 %s475_s13  ;;  %470 = vst.msk [vmem:[#allocation2 + $0x61] sm:$0xff] %vm452_vm1, %v461_v12  ;;  %471 = vst.msk [vmem:[#allocation2 + $0x69] sm:$0xff] %vm452_vm1, %v462_v14  ;;  %1462 = vmatpush3.bf16.msra.mxu1 %v1459_v22  ;;  %v1467_v42 = vpack.c.bf16 %v690_v28, %v689_v27  ;;  %s1964_s18 = smov 32   ;;  %v681_v60 = vld [vmem:[#allocation9 + $0x18] sm:$0xff]  ;;  %v682_v61 = vld [vmem:[#allocation9 + $0x20] sm:$0xff]  ;;  %vm665_vm4 = vcmask 261120  }
  0xe6   : > { %v449_v7 = vstv %s448_s23  ;;  %1464 = vmatprep.subr.bf16.mxu1 %v1463_v24  ;;  %1472 = vmatprep.subr.bf16.mxu0 %v1471_v29  ;;  %v683_v62 = vld [vmem:[#allocation9 + $0x28] sm:$0xff]  ;;  %v933_v4 = vld [vmem:[#allocation9 + $0x60] sm:$0xff]  ;;  %vm691_vm5 = vcmask 392192   ;;  %s420_s21 = scalar_lea.vmem [#allocation12], %s2360_s7  ;;  %s1344_s1 = sshll.u32 %s2718_s11, 10 }
  0xe7   : > { %v450_v8 = vmul.f32 %v449_v7, %v444_v5  ;;  %v451_v9 = vmul.f32 %v449_v7, %v445_v6  ;;  %v477_v13 = vstv %s476_s10  ;;  %1474 = vmatpush3.bf16.msra.mxu0 %v1471_v29  ;;  %v934_v5 = vld [vmem:[#allocation9 + $0x68] sm:$0xff]  ;;  %v1475_v6 = vpack.c.bf16 %v681_v60, %v680_v58  ;;  %s1107_s8 = sshll.u32 %s420_s21, 4  ;;  %s2719_s9 = sld [smem:[#allocation22_spill]]  ;;  %s2575_s8 = int_to_ptr.vmem [resolvable:$true] %s1107_s8 }
  0xe8   : > { %v478_v17 = vmul.f32 %v477_v13, %v472_v15  ;;  %v479_v18 = vmul.f32 %v477_v13, %v473_v16  ;;  %v1479_v7 = vpack.c.bf16 %v683_v62, %v682_v61  ;;  %s2720_s7 = sld [smem:[#allocation28_spill]]  ;;  %s2584_s12 = scalar_lea.sflag [#allocation5], %s365_s6 }
  0xe9   : > { %453 = vst.msk [vmem:[#allocation2 + $0x1] sm:$0xff] %vm452_vm1, %v450_v8  ;;  %454 = vst.msk [vmem:[#allocation2 + $0x9] sm:$0xff] %vm452_vm1, %v451_v9  ;;  %v2411_v30 = vld [vmem:[#allocation2 + $0x20] sm:$0xff]  ;;  %v488_v31 = vld [vmem:[#allocation2 + $0x28] sm:$0x3]  ;;  %1466 = vmatpush3.bf16.msra.mxu1 %v1463_v24  ;;  %v2451_v8 = vpack.c.bf16 %v934_v5, %v933_v4  ;;  %1476 = vmatprep.subr.bf16.mxu0 %v1475_v6  ;;  %s1811_s27 = scalar_lea.vmem %s2575_s8, 1024 }
  0xea   : > { %481 = vst.msk [vmem:[#allocation2 + $0x79] sm:$0xff] %vm452_vm1, %v478_v17  ;;  %482 = vst.msk [vmem:[#allocation2 + $0x81] sm:$0xff] %vm452_vm1, %v479_v18  ;;  %v2413_v32 = vld [vmem:[#allocation2 + $0x18] sm:$0xff]  ;;  %v526_v33 = vrot.slane %v2411_v30, 1  ;;  %v528_v34 = vrot.slane %v488_v31, 1  ;;  %v2418_v37 = vld [vmem:[#allocation2 + $0x30] sm:$0xff]  ;;  %1468 = vmatprep.subr.bf16.mxu1 %v1467_v42  ;;  %p1812_p8 = scmp.ne.s32.totalorder %s2575_s8, %s1811_s27 }
  0xeb   : > { %v525_v35 = vrot.slane %v2413_v32, 1  ;;  %v592_v36 = vrot.slane %v2413_v32, 2  ;;  %v2420_v38 = vld [vmem:[#allocation2 + $0x38] sm:$0xff]  ;;  %v593_v39 = vrot.slane %v2411_v30, 2  ;;  %v530_v40 = vrot.slane %v2418_v37, 1  ;;  %v2455_v13 = vld [vmem:[#allocation2 + $0x50] sm:$0xff]  ;;  %1478 = vmatpush3.bf16.msra.mxu0 %v1475_v6 }
  0xec   : > { %v531_v41 = vrot.slane %v2420_v38, 1  ;;  %v529_v43 = vsel %vm519_vm2, %v526_v33, %v528_v34  ;;  %v595_v45 = vrot.slane %v488_v31, 2  ;;  %v597_v48 = vrot.slane %v2418_v37, 2  ;;  %v491_v50 = vld [vmem:[#allocation2 + $0x40] sm:$0x3]  ;;  %v2457_v15 = vld [vmem:[#allocation2 + $0x48] sm:$0xff]  ;;  %1480 = vmatprep.subr.bf16.mxu0 %v1479_v7 }
  0xed   : > { %v527_v44 = vsel %vm519_vm2, %v525_v35, %v526_v33  ;;  %556 = vrot.lane.b32.xlu1 %v529_v43, %s1963_s4  ;;  %v594_v46 = vsel %vm586_vm3, %v592_v36, %v593_v39  ;;  %v598_v49 = vrot.slane %v2420_v38, 2  ;;  %v533_v55 = vrot.slane %v491_v50, 1  ;;  %1470 = vmatpush3.bf16.msra.mxu1 %v1467_v42  ;;  %v494_v14 = vld [vmem:[#allocation2 + $0x58] sm:$0x3]  ;;  %v2473_v26 = vld [vmem:[#allocation2 + $0x68] sm:$0xff]  ;;  %v2475_v28 = vld [vmem:[#allocation2 + $0x60] sm:$0xff] }
  0xee   : > { %554 = vrot.lane.b32.xlu0 %v527_v44, %s1963_s4  ;;  %v532_v47 = vsel %vm519_vm2, %v530_v40, %v531_v41  ;;  %v596_v53 = vsel %vm586_vm3, %v593_v39, %v595_v45  ;;  %v600_v59 = vrot.slane %v491_v50, 2  ;;  %1495 = vmatprep.subr.bf16.mxu1 %v2451_v8  ;;  %v536_v16 = vrot.slane %v2455_v13, 1  ;;  %v497_v27 = vld [vmem:[#allocation2 + $0x70] sm:$0x3]  ;;  %s2580_s17 = scalar_lea.hbm %s2720_s7, %s1344_s1  ;;  %p2721_p2 = scmp.ne.s32.totalorder %s2719_s9, 0 }
  0xef   : > { %v599_v54 = vsel %vm586_vm3, %v597_v48, %v598_v49  ;;  %v534_v63 = vsel %vm519_vm2, %v531_v41, %v533_v55  ;;  %v538_v19 = vrot.slane %v494_v14, 1  ;;  %v535_v20 = vrot.slane %v2457_v15, 1  ;;  %1482 = vmatpush3.bf16.msra.mxu0 %v1479_v7  ;;  %s1965_s16 = smov [#allocation12]  }
  0xf0   : > { %v2433_v51 = vld [vmem:[#allocation2] sm:$0xff]  ;;  %v2435_v52 = vld [vmem:[#allocation2 + $0x8] sm:$0xff]  ;;  %v485_v3 = vld [vmem:[#allocation2 + $0x10] sm:$0x3]  ;;  %v601_v9 = vsel %vm586_vm3, %v598_v49, %v600_v59  ;;  %1484 = vmatprep.subr.bf16.mxu0 %v2451_v8  ;;  %v603_v21 = vrot.slane %v2455_v13, 2  ;;  %v605_v24 = vrot.slane %v494_v14, 2  ;;  %p1813_p6 = pnand %p1812_p8, %p2721_p2 }
  0xf1   : > { %621 = vrot.lane.b32.xlu1 %v594_v46, %s1964_s18  ;;  %v520_v56 = vrot.slane %v2433_v51, 1  ;;  %v521_v57 = vrot.slane %v2435_v52, 1  ;;  %v587_v1 = vrot.slane %v2433_v51, 2  ;;  %v588_v2 = vrot.slane %v2435_v52, 2  ;;  %v2489_v43 = vld [vmem:[#allocation2 + $0x80] sm:$0xff]  ;;  %v2491_v45 = vld [vmem:[#allocation2 + $0x78] sm:$0xff] }
  0xf2   : > { %558 = vrot.lane.b32.xlu0 %v532_v47, %s1963_s4  ;;  %v523_v11 = vrot.slane %v485_v3, 1  ;;  %v590_v12 = vrot.slane %v485_v3, 2  ;;  %v539_v22 = vsel %vm519_vm2, %v536_v16, %v538_v19  ;;  %v537_v23 = vsel %vm519_vm2, %v535_v20, %v536_v16  ;;  %v500_v44 = vld [vmem:[#allocation2 + $0x88] sm:$0x3]  ;;  %p1814_p12 = pneg %p1813_p6  ;;  %s1815_s3 = sshll.u32 %s1965_s16, 4  ;;  %s1816_s3 = int_to_ptr.vmem [resolvable:$false] %s1815_s3 }
  0xf3   : > { %v522_v0 = vsel %vm519_vm2, %v520_v56, %v521_v57  ;;  %v589_v10 = vsel %vm586_vm3, %v587_v1, %v588_v2  ;;  %v602_v25 = vrot.slane %v2457_v15, 2  ;;  %v541_v29 = vrot.slane %v2473_v26, 1  ;;  %v936_v3 = vld [vmem:[#allocation9 + $0x78] sm:$0xff]  ;;  %s1817_s11 = scalar_lea.vmem %s1816_s3, 2048  ;;  %p1818_p11 = scmp.lt.s32.totalorder %s2575_s8, %s1816_s3 }
  0xf4   : > { %v524_v17 = vsel %vm519_vm2, %v521_v57, %v523_v11  ;;  %v591_v18 = vsel %vm586_vm3, %v588_v2, %v590_v12  ;;  %v606_v31 = vsel %vm586_vm3, %v603_v21, %v605_v24  ;;  %v543_v34 = vrot.slane %v497_v27, 1  ;;  %v935_v2 = vld [vmem:[#allocation9 + $0x70] sm:$0xff]  ;;  %v937_v11 = vld [vmem:[#allocation9 + $0x80] sm:$0xff]  ;;  %v938_v12 = vld [vmem:[#allocation9 + $0x88] sm:$0xff]  ;;  %p1819_p5 = scmp.lt.s32.totalorder %s1817_s11, %s1811_s27 }
  0xf5   : > { %623 = vrot.lane.b32.xlu1 %v596_v53, %s1964_s18  ;;  %v604_v33 = vsel %vm586_vm3, %v602_v25, %v603_v21  ;;  %v540_v35 = vrot.slane %v2475_v28, 1  ;;  %v608_v36 = vrot.slane %v2473_v26, 2  ;;  %v610_v41 = vrot.slane %v497_v27, 2 }
  0xf6   : > { %625 = vrot.lane.b32.xlu0 %v599_v54, %s1964_s18  ;;  %v544_v39 = vsel %vm519_vm2, %v541_v29, %v543_v34  ;;  %v607_v42 = vrot.slane %v2475_v28, 2  ;;  %v546_v46 = vrot.slane %v2489_v43, 1  ;;  %v548_v49 = vrot.slane %v500_v44, 1  ;;  %p1820_p4 = por %p1819_p5, %p1818_p11 }
  0xf7   : > { %v542_v40 = vsel %vm519_vm2, %v540_v35, %v541_v29  ;;  %v611_v47 = vsel %vm586_vm3, %v608_v36, %v610_v41  ;;  %v545_v50 = vrot.slane %v2491_v45, 1  ;;  %v613_v53 = vrot.slane %v2489_v43, 2 }
  0xf8   : > { %v609_v48 = vsel %vm586_vm3, %v607_v42, %v608_v36  ;;  %v549_v54 = vsel %vm519_vm2, %v546_v46, %v548_v49  ;;  %v615_v56 = vrot.slane %v500_v44, 2  ;;  %v612_v57 = vrot.slane %v2491_v45, 2  ;;  %p1821_p10 = pnand %p1820_p4, %p1814_p12 }
  0xf9   : > { %560 = vrot.lane.b32.xlu1 %v534_v63, %s1963_s4  ;;  %v547_v55 = vsel %vm519_vm2, %v545_v50, %v546_v46  ;;  %v1491_v16 = vpack.c.bf16 %v938_v12, %v937_v11 }
  0xfa   : > { %550 = vrot.lane.b32.xlu0 %v522_v0, %s1963_s4  ;;  %v616_v58 = vsel %vm586_vm3, %v613_v53, %v615_v56  ;;  %v614_v59 = vsel %vm586_vm3, %v612_v57, %v613_v53 }
  0xfd   : > { %627 = vrot.lane.b32.xlu1 %v601_v9, %s1964_s18 }
  0xfe   : > { %617 = vrot.lane.b32.xlu0 %v589_v10, %s1964_s18  ;;  %v1487_v10 = vpack.c.bf16 %v936_v3, %v935_v2 }
 0x101   : > { %552 = vrot.lane.b32.xlu1 %v524_v17, %s1963_s4 }
 0x102   : > { %619 = vrot.lane.b32.xlu0 %v591_v18, %s1964_s18 }
 0x105   : > { %564 = vrot.lane.b32.xlu1 %v539_v22, %s1963_s4 }
 0x106   : > { %562 = vrot.lane.b32.xlu0 %v537_v23, %s1963_s4 }
 0x109   : > { %631 = vrot.lane.b32.xlu1 %v606_v31, %s1964_s18 }
 0x10a   : > { %629 = vrot.lane.b32.xlu0 %v604_v33, %s1964_s18 }
 0x10d   : > { %568 = vrot.lane.b32.xlu1 %v544_v39, %s1963_s4 }
 0x10e   : > { %566 = vrot.lane.b32.xlu0 %v542_v40, %s1963_s4 }
 0x111   : > { %635 = vrot.lane.b32.xlu1 %v611_v47, %s1964_s18 }
 0x112   : > { %633 = vrot.lane.b32.xlu0 %v609_v48, %s1964_s18 }
 0x115   : > { %572 = vrot.lane.b32.xlu1 %v549_v54, %s1963_s4 }
 0x116   : > { %570 = vrot.lane.b32.xlu0 %v547_v55, %s1963_s4 }
 0x119   : > { %639 = vrot.lane.b32.xlu1 %v616_v58, %s1964_s18 }
 0x11a   : > { %637 = vrot.lane.b32.xlu0 %v614_v59, %s1964_s18 }
 0x15f   : > { %v557_v60 = vpop.permute.xlu1 %556 }
 0x160   : > { %v555_v61 = vpop.permute.xlu0 %554  ;;  %v656_v4 = vsel %vm452_vm1, %v2411_v30, %v557_v60 }
 0x161   : > { %v655_v62 = vsel %vm452_vm1, %v2413_v32, %v555_v61 }
 0x163   : > { %v622_v63 = vpop.permute.xlu1 %621 }
 0x164   : > { %v559_v0 = vpop.permute.xlu0 %558  ;;  %v668_v1 = vsel %vm665_vm4, %v655_v62, %v622_v63 }
 0x165   : > { %1399 = vmatprep.mubr.msk.f32.mxu1 %vm691_vm5, %v668_v1  ;;  %v657_v5 = vsel %vm452_vm1, %v2418_v37, %v559_v0  ;;  %v1326_v0 = vld [vmem:[#allocation11] ss:$0 sm:$0xff] }
 0x167   : > { %v624_v6 = vpop.permute.xlu1 %623 }
 0x168   : > { %v626_v7 = vpop.permute.xlu0 %625  ;;  %v669_v9 = vsel %vm665_vm4, %v656_v4, %v624_v6 }
 0x169   : > { %v670_v32 = vsel %vm665_vm4, %v657_v5, %v626_v7  ;;  %1400 = vmatmul.mubr.msk.f32.vlgmr.msra.gmra.mrb[0].mxu1 %vm691_vm5, %v669_v9 }
 0x16a   : > { %1402 = vmatprep.mubr.msk.f32.mxu1 %vm691_vm5, %v670_v32  ;;  %1498 = vmatpush3.bf16.msra.mxu1 %v2451_v8 }
 0x16b   : > { %v561_v14 = vpop.permute.xlu1 %560  ;;  %1496 = vmatprep.subr.bf16.mxu1 %v1487_v10 }
 0x16c   : > { %v551_v30 = vpop.permute.xlu0 %550  ;;  %v658_v37 = vsel %vm452_vm1, %v2420_v38, %v561_v14 }
 0x16d   : > { %v653_v17 = vsel %vm452_vm1, %v2433_v51, %v551_v30 }
 0x16e   : > { %1499 = vmatpush3.bf16.msra.mxu1 %v1487_v10 }
 0x16f   : > { %v628_v18 = vpop.permute.xlu1 %627  ;;  %1497 = vmatprep.subr.bf16.mxu1 %v1491_v16 }
 0x170   : > { %v618_v19 = vpop.permute.xlu0 %617  ;;  %v671_v20 = vsel %vm665_vm4, %v658_v37, %v628_v18 }
 0x171   : > { %v666_v21 = vsel %vm665_vm4, %v653_v17, %v618_v19  ;;  %1403 = vmatmul.mubr.msk.f32.gmra.mrb[2].mxu1 %vm691_vm5, %v671_v20 }
 0x172   : > { %1423 = vmatprep.mubr.msk.f32.mxu0 %vm691_vm5, %v666_v21  ;;  %1500 = vmatpush3.bf16.msra.mxu1 %v1491_v16 }
 0x173   : > { %v553_v22 = vpop.permute.xlu1 %552 }
 0x174   : > { %v620_v23 = vpop.permute.xlu0 %619  ;;  %v654_v38 = vsel %vm452_vm1, %v2435_v52, %v553_v22 }
 0x175   : > { %v667_v24 = vsel %vm665_vm4, %v654_v38, %v620_v23 }
 0x176   : > { %1424 = vmatmul.mubr.msk.f32.vlgmr.msra.gmra.mrb[0].mxu0 %vm691_vm5, %v667_v24 }
 0x177   : > { %v565_v51 = vpop.permute.xlu1 %564  ;;  %1426 = vmatprep.mubr.msk.f32.mxu0 %vm691_vm5, %v668_v1  ;;  %1486 = vmatpush3.bf16.msra.mxu0 %v2451_v8 }
 0x178   : > { %v563_v25 = vpop.permute.xlu0 %562  ;;  %1488 = vmatprep.subr.bf16.mxu0 %v1487_v10  ;;  %v660_v27 = vsel %vm452_vm1, %v2455_v13, %v565_v51 }
 0x179   : > { %v659_v29 = vsel %vm452_vm1, %v2457_v15, %v563_v25 }
 0x17a   : > { %1427 = vmatmul.mubr.msk.f32.gmra.mrb[2].mxu0 %vm691_vm5, %v669_v9 }
 0x17b   : > { %v632_v52 = vpop.permute.xlu1 %631  ;;  %1429 = vmatprep.mubr.msk.f32.mxu0 %vm691_vm5, %v670_v32  ;;  %1490 = vmatpush3.bf16.msra.mxu0 %v1487_v10 }
 0x17c   : > { %v630_v31 = vpop.permute.xlu0 %629  ;;  %v673_v33 = vsel %vm665_vm4, %v660_v27, %v632_v52  ;;  %1492 = vmatprep.subr.bf16.mxu0 %v1491_v16 }
 0x17d   : > { %v672_v34 = vsel %vm665_vm4, %v659_v29, %v630_v31 }
 0x17e   : > { %1405 = vmatprep.mubr.msk.f32.mxu1 %vm691_vm5, %v672_v34  ;;  %1430 = vmatmul.mubr.msk.f32.gmra.mrb[4].mxu0 %vm691_vm5, %v671_v20 }
 0x17f   : > { %1406 = vmatmul.mubr.msk.f32.gmra.mrb[4].mxu1 %vm691_vm5, %v673_v33  ;;  %v569_v8 = vpop.permute.xlu1 %568  ;;  %1432 = vmatprep.mubr.msk.f32.mxu0 %vm691_vm5, %v672_v34 }
 0x180   : > { %v567_v13 = vpop.permute.xlu0 %566  ;;  %1494 = vmatpush3.bf16.msra.mxu0 %v1491_v16  ;;  %v662_v15 = vsel %vm452_vm1, %v2473_v26, %v569_v8 }
 0x181   : > { %v661_v35 = vsel %vm452_vm1, %v2475_v28, %v567_v13 }
 0x182   : > { %1433 = vmatmul.mubr.msk.f32.gmra.mrb[6].mxu0 %vm691_vm5, %v673_v33 }
 0x183   : > { %v636_v36 = vpop.permute.xlu1 %635  ;;  %1447 = vmatprep.mubr.msk.f32.mxu0 %vm691_vm5, %v670_v32 }
 0x184   : > { %v634_v39 = vpop.permute.xlu0 %633  ;;  %v675_v40 = vsel %vm665_vm4, %v662_v15, %v636_v36 }
 0x185   : > { %v674_v41 = vsel %vm665_vm4, %v661_v35, %v634_v39 }
 0x186   : > { %1408 = vmatprep.mubr.msk.f32.mxu1 %vm691_vm5, %v674_v41  ;;  %1448 = vmatmul.mubr.msk.f32.vlgmr.msra.gmra.mrb[0].mxu0 %vm691_vm5, %v671_v20 }
 0x187   : > { %1409 = vmatmul.mubr.msk.f32.gmra.mrb[6].mxu1 %vm691_vm5, %v675_v40  ;;  %v573_v42 = vpop.permute.xlu1 %572  ;;  %1450 = vmatprep.mubr.msk.f32.mxu0 %vm691_vm5, %v672_v34 }
 0x188   : > { %1453 = vmatprep.mubr.msk.f32.mxu1 %vm691_vm5, %v674_v41  ;;  %v571_v26 = vpop.permute.xlu0 %570  ;;  %v664_v28 = vsel %vm452_vm1, %v2489_v43, %v573_v42 }
 0x189   : > { %v663_v44 = vsel %vm452_vm1, %v2491_v45, %v571_v26 }
 0x18a   : > { %1451 = vmatmul.mubr.msk.f32.gmra.mrb[2].mxu0 %vm691_vm5, %v673_v33 }
 0x18b   : > { %1454 = vmatmul.mubr.msk.f32.vlgmr.msra.gmra.mrb[8].mxu1 %vm691_vm5, %v675_v40  ;;  %v640_v46 = vpop.permute.xlu1 %639 }
 0x18c   : > { %v638_v47 = vpop.permute.xlu0 %637  ;;  %v677_v48 = vsel %vm665_vm4, %v664_v28, %v640_v46 }
 0x18d   : > { %v676_v49 = vsel %vm665_vm4, %v663_v44, %v638_v47 }
 0x18e   : > { %1456 = vmatprep.mubr.msk.f32.mxu1 %vm691_vm5, %v676_v49 }
 0x18f   : > { %1457 = vmatmul.mubr.msk.f32.gmra.mrb[10].mxu1 %vm691_vm5, %v677_v48 }
 0x23c   : > { %v1401_v50 = vpop.f32.mrb[0].mxu1 }
 0x23d   : > { %v782_v53 = vpop.f32.mrb[1].mxu1 }
 0x244   : > { %v1404_v54 = vpop.f32.mrb[2].mxu1 }
 0x245   : > { %v792_v55 = vpop.f32.mrb[3].mxu1 }
 0x251   : > { %v1431_v57 = vpop.f32.mrb[4].mxu0 }
 0x252   : > { %v1407_v56 = vpop.f32.mrb[4].mxu1  ;;  %v913_v59 = vpop.f32.mrb[5].mxu0 }
 0x253   : > { %v919_v43 = vadd.f32 %v1431_v57, %v1407_v56  ;;  %v802_v58 = vpop.f32.mrb[5].mxu1 }
 0x254   : > { %v914_v45 = vadd.f32 %v913_v59, %v802_v58 }
 0x255   : > { %v1434_v60 = vpop.f32.mrb[6].mxu0 }
 0x256   : > { %v923_v61 = vpop.f32.mrb[7].mxu0 }
 0x259   : > { %v1449_v63 = vpop.f32.mrb[0].mxu0 }
 0x25a   : > { %v1410_v62 = vpop.f32.mrb[6].mxu1  ;;  %v1501_v2 = vadd.f32 %v1449_v63, %v1401_v50  ;;  %v1011_v4 = vpop.f32.mrb[1].mxu0 }
 0x25b   : > { %v929_v1 = vadd.f32 %v1434_v60, %v1410_v62  ;;  %v812_v3 = vpop.f32.mrb[7].mxu1  ;;  %v1502_v6 = vadd.f32 %v1011_v4, %v782_v53 }
 0x25c   : > { %v924_v5 = vadd.f32 %v923_v61, %v812_v3  ;;  %v1066_v7 = vadd.f32 %v1501_v2, %v1326_v0 }
 0x25d   : > { %v1065_v9 = vadd.f32 %v1502_v6, %v1326_v0  ;;  %v1452_v32 = vpop.f32.mrb[2].mxu0 }
 0x25e   : > { %v1455_v10 = vpop.f32.mrb[8].mxu1  ;;  %v1074_v11 = vmax.f32 %v1066_v7, 0.0  ;;  %v1503_v12 = vadd.f32 %v1452_v32, %v1404_v54  ;;  %v1021_v30 = vpop.f32.mrb[3].mxu0 }
 0x25f   : > { %v1055_v14 = vadd.f32 %v1455_v10, %v919_v43  ;;  %v1031_v16 = vpop.f32.mrb[9].mxu1  ;;  %v1073_v37 = vmax.f32 %v1065_v9, 0.0  ;;  %v1504_v17 = vadd.f32 %v1021_v30, %v792_v55 }
 0x260   : > { %v1054_v18 = vadd.f32 %v1031_v16, %v914_v45  ;;  %1082 = vst [vmem:[%s420_s21 + $0x8] sm:$0xff] %v1074_v11  ;;  %v1068_v19 = vadd.f32 %v1503_v12, %v1326_v0 }
 0x261   : > { %v1070_v20 = vadd.f32 %v1326_v0, %v1055_v14  ;;  %1081 = vst [vmem:[%s420_s21] sm:$0xff] %v1073_v37  ;;  %v1067_v21 = vadd.f32 %v1504_v17, %v1326_v0 }
 0x262   : > { %v1069_v22 = vadd.f32 %v1326_v0, %v1054_v18  ;;  %v1458_v23 = vpop.f32.mrb[10].mxu1  ;;  %v1076_v38 = vmax.f32 %v1068_v19, 0.0 }
 0x263   : > { %v1078_v24 = vmax.f32 %v1070_v20, 0.0  ;;  %v1057_v51 = vadd.f32 %v1458_v23, %v929_v1  ;;  %v1041_v25 = vpop.f32.mrb[11].mxu1  ;;  %v1075_v27 = vmax.f32 %v1067_v21, 0.0 }
 0x264   : > { %v1077_v29 = vmax.f32 %v1069_v22, 0.0  ;;  %v1056_v52 = vadd.f32 %v1041_v25, %v924_v5  ;;  %1084 = vst [vmem:[%s420_s21 + $0x18] sm:$0xff] %v1076_v38 }
 0x265   : > { %1086 = vst [vmem:[%s420_s21 + $0x28] sm:$0xff] %v1078_v24  ;;  %v1072_v31 = vadd.f32 %v1326_v0, %v1057_v51  ;;  %1083 = vst [vmem:[%s420_s21 + $0x10] sm:$0xff] %v1075_v27 }
 0x266   : > { %1085 = vst [vmem:[%s420_s21 + $0x20] sm:$0xff] %v1077_v29  ;;  %v1071_v33 = vadd.f32 %v1326_v0, %v1056_v52 }
 0x267   : > { %v1080_v34 = vmax.f32 %v1072_v31, 0.0 }
 0x268   : > { %v1079_v8 = vmax.f32 %v1071_v33, 0.0 }
 0x269   : > { %1088 = vst [vmem:[%s420_s21 + $0x38] sm:$0xff] %v1080_v34 }
 0x26a   : > { %1087 = vst [vmem:[%s420_s21 + $0x30] sm:$0xff] %v1079_v8 }
 0x26b   : > { %1824 = shalt.err (!%p1821_p10)
}
 0x26c   : > { %s1825_s6 = scalar_lea.hbm %s2580_s17, 1024  ;;  %s1829_s23 = scalar_lea.hbm %s2720_s7, 4096 }
 0x26d   : > { %p1826_p0 = scmp.ne.s32.totalorder %s2580_s17, %s1825_s6  ;;  %p1830_p13 = scmp.lt.u32.totalorder %s2580_s17, %s2720_s7 }
 0x26e   : > { %p1831_p7 = scmp.lt.u32.totalorder %s1829_s23, %s1825_s6  ;;  %p1833_p8 = scmp.lt.u32.totalorder %s1825_s6, %s2580_s17 }
 0x26f   : > { %p1827_p9 = pnand %p1826_p0, %p2721_p2 }
 0x270   : > { %p1832_p3 = por %p1831_p7, %p1830_p13 }
 0x271   : > { %p1828_p1 = pneg %p1827_p9 }
 0x272   : > { %p1834_p6 = por %p1833_p8, %p1832_p3 }
 0x274   : > { %p1835_p12 = pnand %p1834_p6, %p1828_p1 }
 0x276   : > { %1838 = shalt.err (!%p1835_p12)
}
 0x277   : > { %s1966_s18 = smov 128   ;;  %s1967_s21 = smov 8  }
 0x278   : > { %1531 = dma.vmem_to_hbm [thread:$0]  (%p2721_p2), %s2575_s8, 1024, %s2580_s17, %s2584_s12, %s1966_s18, %s1966_s18, %s1967_s21  }
 0x279 PF: > { %s2722_s1 = sld [smem:[#allocation18_spill]]  ;;  %s2723_s14 = sld [smem:[#allocation24_spill]] }
 0x27a   : > { %p1559_p11 = scmp.ge.s32.totalorder %s1953_s29, 2 }
 0x27f   : > { %s1122_s5 = sand.u32 1, %s2722_s1   ;;  %p2724_p5 = scmp.ne.s32.totalorder %s2723_s14, 0 }
 0x280   : > { %s1123_s27 = scalar_lea.sflag [#allocation5], %s1122_s5 }
 0x281   : > { %p1551_p4 = pnand %p1559_p11, %p2724_p5 }
 0x283   : > { %1904 = dma.done.wait (!%p1551_p4), %s1123_s27, 1024  }
 0x284   : > { %1906 = vsyncadd (!%p1551_p4), %s1123_s27, 4294966272  ;;  %s25_s29 = sadd.s32 1, %s1953_s29   ;;  %s2725_s9 = sld [smem:[#allocation19_spill]] }
 0x285   : > { %p22_p10 = scmp.ge.s32.totalorder %s25_s29, 6   ;;  %s2726_s23 = sld [smem:[#allocation23_spill]] }
 0x286   : > { %s2727_s8 = sld [smem:[#allocation21_spill]]  ;;  %s2728_s18 = smov %s1913_s19 }
 0x287   : > { %s2729_s19 = smov %s1917_s20  ;;  %s2730_s20 = smov %s2302_s24 }
 0x288   : > { %s2731_s21 = smov %s1925_s22  ;;  %s2733_s24 = smov %s1937_s25 }
 0x289   : > { %s2734_s25 = smov %s1941_s26  ;;  %s2735_s26 = smov %s2231_s15 }
 0x28a   : > { %s2732_s22 = smov %s2725_s9  ;;  %s2736_s27 = smov %s1949_s28 }
 0x28b   :  { %24 = sbr.rel (!%p22_p10) target bundleno = 17 (0x11), region = 123 }
 0x28c   : > { %s2737_s28 = smov %s2727_s8 }
 0x292   :  { %1128 = vsyncpa [#allocation4], 1 }
 0x293   :  { %1130 = vsyncpa [#allocation4 + $0x1], 1 }
 0x294   :  { %1131 = vsyncpa [#allocation7], 1 }
 0x295   :  { %1133 = vsyncpa [#allocation7 + $0x1], 1 }
 0x296   :  { %1134 = vsyncpa [#allocation10], 1 }
 0x297   :  { %1135 = vsyncpa [#allocation5], 1 }
 0x298   :  { %1137 = vsyncpa [#allocation5 + $0x1], 1 }

</bundles_post_ra>
